<compile_context>
chip_gen: v7x
topology: tpu7x:2x2x1
jax: 0.10.0
libtpu: 0.0.40
codegen_flags: <defaults>
</compile_context>

<pallas_src>
import jax
import jax.numpy as jnp
from jax.experimental import pallas as pl
from jax.experimental.pallas import tpu as pltpu

INPUT_SIZE = 196
HIDDEN_SIZE = 10
NUM_CLASSES = 10

# Padded (lane-dense) dims used inside the kernel.
PAD_IN = 256     # 196 -> 256 (multiple of 128) for clean aligned loads
PAD_HID = 128    # 10  -> 128 hidden width, unmasked matmul K dim
PAD_OUT = 128    # 10  -> 128 output width, unmasked 128-wide stores


def _round_up(n, m):
    return ((n + m - 1) // m) * m


def mlp_kernel(x_ref, w1_ref, b1_ref, w2_ref, b2_ref, o_ref):
    # First linear layer: [TB, 256] @ [256, 128] -> f32 accumulate on MXU.
    h = jnp.dot(x_ref[...], w1_ref[...], preferred_element_type=jnp.float32)
    # Bias + ReLU on full (unmasked) 128-lane vregs.
    h = jnp.maximum(h + b1_ref[...], 0.0)
    # Second linear layer: [TB, 128] @ [128, 128] -> f32 accumulate.
    out = jnp.dot(h.astype(w2_ref.dtype), w2_ref[...],
                  preferred_element_type=jnp.float32)
    o_ref[...] = (out + b2_ref[...]).astype(o_ref.dtype)


def neural_net_forward(x, w1, b1, w2, b2, *, batch_tile=1024,
                       compute_dtype=jnp.float32):
    """Forward pass of NeuralNet.

    x:  [B, 196] f32
    w1: [196, 10]  (in, out layout — transpose of PyTorch's [out, in])
    b1: [1, 10]
    w2: [10, 10]
    b2: [1, 10]

    Returns [B, 10] f32 logits.

    `compute_dtype=jnp.bfloat16` halves HBM traffic for the dominant x read
    on v6e/v7x (accumulation stays f32); default f32 keeps exact parity with
    the PyTorch module.
    """
    B, in_dim = x.shape
    assert in_dim == INPUT_SIZE

    # Batch tile: multiple of 8 sublanes, capped by (padded) batch size.
    TB = min(batch_tile, _round_up(B, 8))
    Bp = _round_up(B, TB)

    # Zero-pad everything to lane-dense shapes. Zero rows/cols keep the math
    # exact: padded hidden cols of w1/b1 are 0 -> relu(0)=0; padded hidden
    # rows of w2 are 0 -> no contribution; padded output cols are sliced off.
    xp = jnp.zeros((Bp, PAD_IN), compute_dtype)
    xp = xp.at[:B, :INPUT_SIZE].set(x.astype(compute_dtype))

    w1p = jnp.zeros((PAD_IN, PAD_HID), compute_dtype)
    w1p = w1p.at[:INPUT_SIZE, :HIDDEN_SIZE].set(w1.astype(compute_dtype))

    b1p = jnp.zeros((1, PAD_HID), jnp.float32)
    b1p = b1p.at[:, :HIDDEN_SIZE].set(b1.astype(jnp.float32))

    w2p = jnp.zeros((PAD_HID, PAD_OUT), compute_dtype)
    w2p = w2p.at[:HIDDEN_SIZE, :NUM_CLASSES].set(w2.astype(compute_dtype))

    b2p = jnp.zeros((1, PAD_OUT), jnp.float32)
    b2p = b2p.at[:, :NUM_CLASSES].set(b2.astype(jnp.float32))

    grid = (Bp // TB,)

    out_padded = pl.pallas_call(
        mlp_kernel,
        out_shape=jax.ShapeDtypeStruct((Bp, PAD_OUT), jnp.float32),
        grid_spec=pl.GridSpec(
            grid=grid,
            in_specs=[
                # x: tiled along the batch axis (double-buffered DMA).
                pl.BlockSpec((TB, PAD_IN), lambda i: (i, 0)),
                # Weights / biases: constant index map -> stay VMEM-resident.
                pl.BlockSpec((PAD_IN, PAD_HID), lambda i: (0, 0)),
                pl.BlockSpec((1, PAD_HID), lambda i: (0, 0)),
                pl.BlockSpec((PAD_HID, PAD_OUT), lambda i: (0, 0)),
                pl.BlockSpec((1, PAD_OUT), lambda i: (0, 0)),
            ],
            out_specs=pl.BlockSpec((TB, PAD_OUT), lambda i: (i, 0)),
        ),
        compiler_params=pltpu.CompilerParams(
            # Batch axis is fully independent -> shard across TCs on v7x.
            dimension_semantics=("parallel",),
            # Per-step footprint is tiny (a few MiB even at TB=4096), but be
            # explicit so large batch tiles never trip the scoped default.
            vmem_limit_bytes=64 * 1024 * 1024,
        ),
    )(xp, w1p, b1p, w2p, b2p)

    # Strip batch padding and the lane padding of the output.
    return out_padded[:B, :NUM_CLASSES]


def init_params(key):
    """Deterministic init mimicking PyTorch's default nn.Linear init:
    U(-1/sqrt(fan_in), 1/sqrt(fan_in)) for both weights and biases."""
    k1, k2, k3, k4 = jax.random.split(key, 4)
    bound1 = 1.0 / jnp.sqrt(jnp.float32(INPUT_SIZE))
    bound2 = 1.0 / jnp.sqrt(jnp.float32(HIDDEN_SIZE))
    # Stored as [in, out] (transpose of PyTorch's [out, in] layout).
    w1 = jax.random.uniform(k1, (INPUT_SIZE, HIDDEN_SIZE), jnp.float32,
                            minval=-bound1, maxval=bound1)
    b1 = jax.random.uniform(k2, (1, HIDDEN_SIZE), jnp.float32,
                            minval=-bound1, maxval=bound1)
    w2 = jax.random.uniform(k3, (HIDDEN_SIZE, NUM_CLASSES), jnp.float32,
                            minval=-bound2, maxval=bound2)
    b2 = jax.random.uniform(k4, (1, NUM_CLASSES), jnp.float32,
                            minval=-bound2, maxval=bound2)
    return w1, b1, w2, b2


if __name__ == "__main__":
    key = jax.random.PRNGKey(0)
    k_params, k_x = jax.random.split(key)

    w1, b1, w2, b2 = init_params(k_params)

    batch = 8
    x = jax.random.normal(k_x, (batch, INPUT_SIZE), dtype=jnp.float32)

    out = neural_net_forward(x, w1, b1, w2, b2)
    out = jax.block_until_ready(out)

    # Reference check in plain JAX (same math as the PyTorch forward).
    ref = jnp.maximum(x @ w1 + b1, 0.0) @ w2 + b2
    assert out.shape == (batch, NUM_CLASSES)
    assert jnp.allclose(out, ref, atol=1e-5, rtol=1e-5)

    print("KERNEL_OK")
</pallas_src>

<mosaic_0001>
module attributes {stable_mosaic.version = 11 : i64} {
  func.func @mlp_kernel(%arg0: i32, %arg1: memref<8x256xf32, #tpu.memory_space<vmem>>, %arg2: memref<256x128xf32, #tpu.memory_space<vmem>>, %arg3: memref<1x128xf32, #tpu.memory_space<vmem>>, %arg4: memref<128x128xf32, #tpu.memory_space<vmem>>, %arg5: memref<1x128xf32, #tpu.memory_space<vmem>>, %arg6: memref<8x128xf32, #tpu.memory_space<vmem>>) attributes {dimension_semantics = [#tpu.dimension_semantics<parallel>], iteration_bounds = array<i64: 1>, scalar_prefetch = 0 : i64, scratch_operands = 0 : i64, tpu.core_type = #tpu.core_type<tc>, window_params = [{transform_indices = @transform_0, window_bounds = array<i64: 8, 256>}, {pipeline_mode = #tpu.pipeline_mode<synchronous>, transform_indices = @transform_1, window_bounds = array<i64: 256, 128>}, {pipeline_mode = #tpu.pipeline_mode<synchronous>, transform_indices = @transform_2, window_bounds = array<i64: 1, 128>}, {pipeline_mode = #tpu.pipeline_mode<synchronous>, transform_indices = @transform_3, window_bounds = array<i64: 128, 128>}, {pipeline_mode = #tpu.pipeline_mode<synchronous>, transform_indices = @transform_4, window_bounds = array<i64: 1, 128>}, {transform_indices = @transform_5, window_bounds = array<i64: 8, 128>}]} {
    %c0 = arith.constant 0 : index
    %c0_0 = arith.constant 0 : index
    %0 = vector.load %arg1[%c0, %c0_0] : memref<8x256xf32, #tpu.memory_space<vmem>>, vector<8x256xf32>
    %c0_1 = arith.constant 0 : index
    %c0_2 = arith.constant 0 : index
    %1 = vector.load %arg2[%c0_1, %c0_2] : memref<256x128xf32, #tpu.memory_space<vmem>>, vector<256x128xf32>
    %cst = arith.constant dense<0.000000e+00> : vector<8x128xf32>
    %2 = tpu.matmul %0, %1, %cst {dimension_numbers = #tpu.dot_dimension_numbers<[1], [0], [0], [1], [0, 0, 1, 1], [], []>} : vector<8x256xf32>, vector<256x128xf32>, vector<8x128xf32> -> vector<8x128xf32>
    %c0_3 = arith.constant 0 : index
    %c0_4 = arith.constant 0 : index
    %3 = vector.load %arg3[%c0_3, %c0_4] : memref<1x128xf32, #tpu.memory_space<vmem>>, vector<1x128xf32>
    %4 = vector.broadcast %3 : vector<1x128xf32> to vector<8x128xf32>
    %5 = arith.addf %2, %4 : vector<8x128xf32>
    %cst_5 = arith.constant 0.000000e+00 : f32
    %6 = vector.broadcast %cst_5 : f32 to vector<8x128xf32>
    %7 = arith.maximumf %5, %6 : vector<8x128xf32>
    %c0_6 = arith.constant 0 : index
    %c0_7 = arith.constant 0 : index
    %8 = vector.load %arg4[%c0_6, %c0_7] : memref<128x128xf32, #tpu.memory_space<vmem>>, vector<128x128xf32>
    %cst_8 = arith.constant dense<0.000000e+00> : vector<8x128xf32>
    %9 = tpu.matmul %7, %8, %cst_8 {dimension_numbers = #tpu.dot_dimension_numbers<[1], [0], [0], [1], [0, 0, 1, 1], [], []>} : vector<8x128xf32>, vector<128x128xf32>, vector<8x128xf32> -> vector<8x128xf32>
    %c0_9 = arith.constant 0 : index
    %c0_10 = arith.constant 0 : index
    %10 = vector.load %arg5[%c0_9, %c0_10] : memref<1x128xf32, #tpu.memory_space<vmem>>, vector<1x128xf32>
    %11 = vector.broadcast %10 : vector<1x128xf32> to vector<8x128xf32>
    %12 = arith.addf %9, %11 : vector<8x128xf32>
    %c0_11 = arith.constant 0 : index
    %c0_12 = arith.constant 0 : index
    %13 = vector.load %arg6[%c0_11, %c0_12] : memref<8x128xf32, #tpu.memory_space<vmem>>, vector<8x128xf32>
    tpu.vector_store %arg6[%c0_11, %c0_12], %12 {strides = array<i32>} : memref<8x128xf32, #tpu.memory_space<vmem>>, vector<8x128xf32>,
    return
  }
  func.func @transform_0(%arg0: i32) -> (i32, i32) {
    %c0_i32 = arith.constant 0 : i32
    %c0_i32_0 = arith.constant 0 : i32
    return %arg0, %c0_i32 : i32, i32
  }
  func.func @transform_1(%arg0: i32) -> (i32, i32) {
    %c0_i32 = arith.constant 0 : i32
    %c0_i32_0 = arith.constant 0 : i32
    %c0_i32_1 = arith.constant 0 : i32
    return %c0_i32, %c0_i32_0 : i32, i32
  }
  func.func @transform_2(%arg0: i32) -> (i32, i32) {
    %c0_i32 = arith.constant 0 : i32
    %c0_i32_0 = arith.constant 0 : i32
    %c0_i32_1 = arith.constant 0 : i32
    return %c0_i32, %c0_i32_0 : i32, i32
  }
  func.func @transform_3(%arg0: i32) -> (i32, i32) {
    %c0_i32 = arith.constant 0 : i32
    %c0_i32_0 = arith.constant 0 : i32
    %c0_i32_1 = arith.constant 0 : i32
    return %c0_i32, %c0_i32_0 : i32, i32
  }
  func.func @transform_4(%arg0: i32) -> (i32, i32) {
    %c0_i32 = arith.constant 0 : i32
    %c0_i32_0 = arith.constant 0 : i32
    %c0_i32_1 = arith.constant 0 : i32
    return %c0_i32, %c0_i32_0 : i32, i32
  }
  func.func @transform_5(%arg0: i32) -> (i32, i32) {
    %c0_i32 = arith.constant 0 : i32
    %c0_i32_0 = arith.constant 0 : i32
    return %arg0, %c0_i32 : i32, i32
  }
}

</mosaic_0001>

<bundles_post_ra>
// kernel: tpu_custom_call.1
= control target key start
LH: loop header
LB: loop body
LE: loop exit
PB: predicated region body
PF: predicated region fallthrough
CT: control target
= control target key end

     0   :  { %10 = vsyncpa [#allocation3], 0  ;;  %s723_s0 = inlined_call_operand.hbm [shape: f32[8,256], index: 0, kind: input, shape index: {}]   ;;  %s724_s1 = inlined_call_operand.hbm [shape: f32[256,128], index: 1, kind: input, shape index: {}]   ;;  %s725_s2 = inlined_call_operand.hbm [shape: f32[1,128], index: 2, kind: input, shape index: {}]   ;;  %s726_s3 = inlined_call_operand.hbm [shape: f32[128,128], index: 3, kind: input, shape index: {}]   ;;  %s727_s4 = inlined_call_operand.hbm [shape: f32[1,128], index: 4, kind: input, shape index: {}]   ;;  %s728_s5 = inlined_call_operand.hbm [shape: f32[8,128], index: 5, kind: output, shape index: {}]  }
   0x1   :  { %11 = vsyncpa [#allocation6], 0 }
   0x2   :  { %12 = vsyncpa [#allocation9], 0 }
   0x3   :  { %13 = vsyncpa [#allocation4], 0  ;;  %s602_s18 = smov [#allocation5]   ;;  %s462_s22 = scalar_lea.hbm %s724_s1, 4096 }
   0x4   :  { %s29_s19 = sshll.u32 %s602_s18, 4  ;;  %p463_p0 = scmp.ne.s32.totalorder %s724_s1, %s462_s22  ;;  %s30_s19 = int_to_ptr.vmem [resolvable:$true] %s29_s19 }
   0x5   :  { %p466_p1 = scmp.lt.u32.totalorder %s462_s22, %s724_s1 }
   0x7   :  { %p468_p2 = pnand %p466_p1, %p463_p0 }
   0x9   :  { %471 = shalt.err (!%p468_p2)
}
   0xa   :  { %s472_s27 = scalar_lea.vmem %s30_s19, 4096  ;;  %p477_p4 = scmp.lt.s32.totalorder %s30_s19, %s30_s19 }
   0xb   :  { %p473_p3 = scmp.ne.s32.totalorder %s30_s19, %s472_s27  ;;  %p478_p5 = scmp.lt.s32.totalorder %s472_s27, %s472_s27 }
   0xd   :  { %p479_p6 = por %p478_p5, %p477_p4 }
   0xf   :  { %p480_p7 = pnand %p479_p6, %p473_p3 }
  0x11   :  { %483 = shalt.err (!%p480_p7)
}
  0x12   :  { %s603_s28 = smov 128   ;;  %s604_s29 = smov 8  }
  0x13   :  { %35 = dma.hbm_to_vmem [thread:$0]  %s724_s1, 4096, %s30_s19, [#allocation6], %s603_s28, %s603_s28, %s604_s29  }
  0x14   :  { %s605_s7 = smov [#allocation8]   ;;  %s606_s9 = smov [#allocation2]  }
  0x15   :  { %s51_s8 = sshll.u32 %s605_s7, 4  ;;  %s20_s10 = sshll.u32 %s606_s9, 4  ;;  %s52_s8 = int_to_ptr.vmem [resolvable:$true] %s51_s8  ;;  %s21_s10 = int_to_ptr.vmem [resolvable:$true] %s20_s10 }
  0x16   :  { %s484_s13 = scalar_lea.hbm %s726_s3, 2048 }
  0x17   :  { %p485_p8 = scmp.ne.s32.totalorder %s726_s3, %s484_s13  ;;  %p488_p9 = scmp.lt.u32.totalorder %s484_s13, %s726_s3 }
  0x19   :  { %p490_p10 = pnand %p488_p9, %p485_p8 }
  0x1b   :  { %493 = shalt.err (!%p490_p10)
}
  0x1c   :  { %s494_s1 = scalar_lea.vmem %s52_s8, 2048  ;;  %p499_p12 = scmp.lt.s32.totalorder %s52_s8, %s52_s8 }
  0x1d   :  { %p495_p11 = scmp.ne.s32.totalorder %s52_s8, %s494_s1  ;;  %p500_p13 = scmp.lt.s32.totalorder %s494_s1, %s494_s1 }
  0x1f   :  { %p501_p0 = por %p500_p13, %p499_p12 }
  0x21   :  { %p502_p1 = pnand %p501_p0, %p495_p11 }
  0x23   :  { %505 = shalt.err (!%p502_p1)
}
  0x24   :  { %57 = dma.hbm_to_vmem [thread:$0]  %s726_s3, 2048, %s52_s8, [#allocation9], %s603_s28, %s603_s28, %s604_s29  }
  0x25   :  { %s506_s22 = scalar_lea.hbm %s723_s0, 256 }
  0x26   :  { %p507_p2 = scmp.ne.s32.totalorder %s723_s0, %s506_s22  ;;  %p510_p3 = scmp.lt.u32.totalorder %s506_s22, %s723_s0 }
  0x28   :  { %p512_p4 = pnand %p510_p3, %p507_p2 }
  0x2a   :  { %515 = shalt.err (!%p512_p4)
}
  0x2b   :  { %s516_s27 = scalar_lea.vmem %s21_s10, 256  ;;  %p521_p6 = scmp.lt.s32.totalorder %s21_s10, %s21_s10 }
  0x2c   :  { %p517_p5 = scmp.ne.s32.totalorder %s21_s10, %s516_s27  ;;  %p522_p7 = scmp.lt.s32.totalorder %s516_s27, %s516_s27 }
  0x2e   :  { %p523_p8 = por %p522_p7, %p521_p6 }
  0x30   :  { %p524_p9 = pnand %p523_p8, %p517_p5 }
  0x32   :  { %527 = shalt.err (!%p524_p9)
}
  0x33   :  { %23 = dma.hbm_to_vmem [thread:$0]  %s723_s0, 256, %s21_s10, [#allocation3]  }
  0x34   :  { %s607_s29 = smov [#allocation7]   ;;  %s608_s6 = smov [#allocation10]  }
  0x35   :  { %s42_s30 = sshll.u32 %s607_s29, 4  ;;  %s64_s7 = sshll.u32 %s608_s6, 4  ;;  %s43_s30 = int_to_ptr.vmem [resolvable:$true] %s42_s30  ;;  %s65_s7 = int_to_ptr.vmem [resolvable:$true] %s64_s7 }
  0x36   :  { %s528_s11 = scalar_lea.hbm %s725_s2, 16 }
  0x37   :  { %p529_p10 = scmp.ne.s32.totalorder %s725_s2, %s528_s11  ;;  %p532_p11 = scmp.lt.u32.totalorder %s528_s11, %s725_s2 }
  0x39   :  { %p534_p12 = pnand %p532_p11, %p529_p10 }
  0x3b   :  { %537 = shalt.err (!%p534_p12)
}
  0x3c   :  { %s538_s0 = scalar_lea.vmem %s43_s30, 16  ;;  %s542_s10 = scalar_lea.vmem %s43_s30, 32 }
  0x3d   :  { %p539_p13 = scmp.ne.s32.totalorder %s43_s30, %s538_s0  ;;  %p543_p0 = scmp.lt.s32.totalorder %s43_s30, %s43_s30 }
  0x3e   :  { %p544_p1 = scmp.lt.s32.totalorder %s542_s10, %s538_s0 }
  0x40   :  { %p545_p2 = por %p544_p1, %p543_p0 }
  0x42   :  { %p546_p3 = pnand %p545_p2, %p539_p13 }
  0x44   :  { %549 = shalt.err (!%p546_p3)
}
  0x45   :  { %45 = dma.hbm_to_vmem [thread:$0]  %s725_s2, 16, %s43_s30, [#allocation6]  }
  0x46   :  { %s550_s19 = scalar_lea.hbm %s727_s4, 16 }
  0x47   :  { %p551_p4 = scmp.ne.s32.totalorder %s727_s4, %s550_s19  ;;  %p554_p5 = scmp.lt.u32.totalorder %s550_s19, %s727_s4 }
  0x49   :  { %p556_p6 = pnand %p554_p5, %p551_p4 }
  0x4b   :  { %559 = shalt.err (!%p556_p6)
}
  0x4c   :  { %s560_s24 = scalar_lea.vmem %s65_s7, 16  ;;  %s564_s25 = scalar_lea.vmem %s65_s7, 32 }
  0x4d   :  { %p561_p7 = scmp.ne.s32.totalorder %s65_s7, %s560_s24  ;;  %p565_p8 = scmp.lt.s32.totalorder %s65_s7, %s65_s7 }
  0x4e   :  { %p566_p9 = scmp.lt.s32.totalorder %s564_s25, %s560_s24 }
  0x50   :  { %p567_p10 = por %p566_p9, %p565_p8 }
  0x52   :  { %p568_p11 = pnand %p567_p10, %p561_p7 }
  0x54   :  { %571 = shalt.err (!%p568_p11)
}
  0x55   :  { %67 = dma.hbm_to_vmem [thread:$0]  %s727_s4, 16, %s65_s7, [#allocation9]  }
  0x56   :  { %594 = dma.done.wait [#allocation3], 256  }
  0x57   :  { %595 = vsyncadd [#allocation3], 4294967040 }
  0x58   :  { %596 = dma.done.wait [#allocation6], 4112  }
  0x59   :  { %597 = vsyncadd [#allocation6], 4294963184 }
  0x5a   :  { %598 = dma.done.wait [#allocation9], 2064  }
  0x5b   :  { %599 = vsyncadd [#allocation9], 4294965232  ;;  %v609_v0 = vmov 0.0|0.0   ;;  %v101_v1 = vld [vmem:[#allocation5 + $0x80] sm:$0xff]  ;;  %v102_v2 = vld [vmem:[#allocation5 + $0x88] sm:$0xff]  ;;  %vm610_vm0 = vmmov 0  }
  0x5c   :  { %427 = vmatprep.subr.bf16.mxu1 %v609_v0  ;;  %v85_v3 = vld [vmem:[#allocation5] sm:$0xff]  ;;  %v395_v4 = vpack.c.bf16 %v102_v2, %v101_v1  ;;  %v86_v5 = vld [vmem:[#allocation5 + $0x8] sm:$0xff]  ;;  %v103_v6 = vld [vmem:[#allocation5 + $0x90] sm:$0xff]  ;;  %s612_s4 = smov [#allocation11]  }
  0x5d   :  { %v104_v7 = vld [vmem:[#allocation5 + $0x98] sm:$0xff]  ;;  %v397_v8 = vpack.c.bf16 %v86_v5, %v85_v3  ;;  %v87_v10 = vld [vmem:[#allocation5 + $0x10] sm:$0xff]  ;;  %v105_v12 = vld [vmem:[#allocation5 + $0xa0] sm:$0xff]  ;;  %s295_s27 = sshll.u32 %s612_s4, 4  ;;  %s296_s27 = int_to_ptr.vmem [resolvable:$true] %s295_s27 }
  0x5e   :  { %v399_v9 = vpack.c.bf16 %v104_v7, %v103_v6  ;;  %v88_v11 = vld [vmem:[#allocation5 + $0x18] sm:$0xff]  ;;  %396 = vmatprep.subr.bf16.mxu0 %v395_v4  ;;  %v106_v13 = vld [vmem:[#allocation5 + $0xa8] sm:$0xff]  ;;  %v89_v16 = vld [vmem:[#allocation5 + $0x20] sm:$0xff]  ;;  %s572_s3 = scalar_lea.vmem %s296_s27, 128  ;;  %p577_p13 = scmp.lt.s32.totalorder %s296_s27, %s296_s27 }
  0x5f   :  { %398 = vmatpush3.bf16.msra.mxu0 %v397_v8  ;;  %v401_v14 = vpack.c.bf16 %v88_v11, %v87_v10  ;;  %v403_v15 = vpack.c.bf16 %v106_v13, %v105_v12  ;;  %v90_v17 = vld [vmem:[#allocation5 + $0x28] sm:$0xff]  ;;  %v107_v18 = vld [vmem:[#allocation5 + $0xb0] sm:$0xff]  ;;  %v108_v19 = vld [vmem:[#allocation5 + $0xb8] sm:$0xff]  ;;  %v611_v12 = vmov 0.0   ;;  %p573_p12 = scmp.ne.s32.totalorder %s296_s27, %s572_s3  ;;  %p578_p0 = scmp.lt.s32.totalorder %s572_s3, %s572_s3 }
  0x60   :  { %400 = vmatprep.subr.bf16.mxu0 %v399_v9  ;;  %v405_v20 = vpack.c.bf16 %v90_v17, %v89_v16  ;;  %v407_v21 = vpack.c.bf16 %v108_v19, %v107_v18  ;;  %v91_v22 = vld [vmem:[#allocation5 + $0x30] sm:$0xff]  ;;  %v92_v23 = vld [vmem:[#allocation5 + $0x38] sm:$0xff]  ;;  %v109_v24 = vld [vmem:[#allocation5 + $0xc0] sm:$0xff]  ;;  %392 = vmatprep.mubr.msk.f32.mxu1 %vm610_vm0, %v611_v12 }
  0x61   :  { %v110_v25 = vld [vmem:[#allocation5 + $0xc8] sm:$0xff]  ;;  %v84_v26 = vld [vmem:[#allocation2 + $0x8] sm:$0xff]  ;;  %v409_v29 = vpack.c.bf16 %v92_v23, %v91_v22  ;;  %v93_v34 = vld [vmem:[#allocation5 + $0x40] sm:$0xff]  ;;  %p579_p1 = por %p578_p0, %p577_p13 }
  0x62   :  { %188 = vmatprep.mubr.f32.mxu0 %v84_v26  ;;  %v195_v27 = vld [vmem:[#allocation8] sm:$0xff]  ;;  %v196_v28 = vld [vmem:[#allocation8 + $0x8] sm:$0xff]  ;;  %v197_v31 = vld [vmem:[#allocation8 + $0x10] sm:$0xff]  ;;  %v411_v33 = vpack.c.bf16 %v110_v25, %v109_v24 }
  0x63   :  { %402 = vmatpush3.bf16.msra.mxu0 %v401_v14  ;;  %v428_v30 = vpack.c.bf16 %v196_v28, %v195_v27  ;;  %v198_v32 = vld [vmem:[#allocation8 + $0x18] sm:$0xff]  ;;  %v94_v35 = vld [vmem:[#allocation5 + $0x48] sm:$0xff]  ;;  %v111_v36 = vld [vmem:[#allocation5 + $0xd0] sm:$0xff]  ;;  %p580_p2 = pnand %p579_p1, %p573_p12 }
  0x64   :  { %404 = vmatprep.subr.bf16.mxu0 %v403_v15  ;;  %v112_v37 = vld [vmem:[#allocation5 + $0xd8] sm:$0xff]  ;;  %v431_v38 = vpack.c.bf16 %v198_v32, %v197_v31  ;;  %v199_v39 = vld [vmem:[#allocation8 + $0x20] sm:$0xff]  ;;  %v200_v40 = vld [vmem:[#allocation8 + $0x28] sm:$0xff]  ;;  %v413_v41 = vpack.c.bf16 %v94_v35, %v93_v34 }
  0x65   :  { %429 = vmatpush3.bf16.msra.mxu1 %v428_v30  ;;  %v415_v42 = vpack.c.bf16 %v112_v37, %v111_v36  ;;  %v95_v43 = vld [vmem:[#allocation5 + $0x50] sm:$0xff]  ;;  %v96_v44 = vld [vmem:[#allocation5 + $0x58] sm:$0xff]  ;;  %v113_v45 = vld [vmem:[#allocation5 + $0xe0] sm:$0xff]  ;;  %v434_v47 = vpack.c.bf16 %v200_v40, %v199_v39 }
  0x66   :  { %430 = vmatprep.subr.bf16.mxu1 %v609_v0  ;;  %v114_v46 = vld [vmem:[#allocation5 + $0xe8] sm:$0xff]  ;;  %v201_v48 = vld [vmem:[#allocation8 + $0x30] sm:$0xff]  ;;  %v202_v49 = vld [vmem:[#allocation8 + $0x38] sm:$0xff]  ;;  %v417_v50 = vpack.c.bf16 %v96_v44, %v95_v43 }
  0x67   :  { %406 = vmatpush3.bf16.msra.mxu0 %v405_v20  ;;  %v419_v51 = vpack.c.bf16 %v114_v46, %v113_v45  ;;  %v97_v52 = vld [vmem:[#allocation5 + $0x60] sm:$0xff]  ;;  %v98_v53 = vld [vmem:[#allocation5 + $0x68] sm:$0xff]  ;;  %v115_v54 = vld [vmem:[#allocation5 + $0xf0] sm:$0xff]  ;;  %v437_v56 = vpack.c.bf16 %v202_v49, %v201_v48 }
  0x68   :  { %408 = vmatprep.subr.bf16.mxu0 %v407_v21  ;;  %v116_v55 = vld [vmem:[#allocation5 + $0xf8] sm:$0xff]  ;;  %v203_v57 = vld [vmem:[#allocation8 + $0x40] sm:$0xff]  ;;  %v204_v58 = vld [vmem:[#allocation8 + $0x48] sm:$0xff]  ;;  %v421_v59 = vpack.c.bf16 %v98_v53, %v97_v52 }
  0x69   :  { %432 = vmatpush3.bf16.msra.mxu1 %v431_v38  ;;  %v423_v60 = vpack.c.bf16 %v116_v55, %v115_v54  ;;  %v99_v61 = vld [vmem:[#allocation5 + $0x70] sm:$0xff]  ;;  %v100_v62 = vld [vmem:[#allocation5 + $0x78] sm:$0xff]  ;;  %v440_v63 = vpack.c.bf16 %v204_v58, %v203_v57  ;;  %v207_v6 = vld [vmem:[#allocation8 + $0x60] sm:$0xff] }
  0x6a   :  { %433 = vmatprep.subr.bf16.mxu1 %v609_v0  ;;  %v205_v1 = vld [vmem:[#allocation8 + $0x50] sm:$0xff]  ;;  %v206_v2 = vld [vmem:[#allocation8 + $0x58] sm:$0xff]  ;;  %v425_v3 = vpack.c.bf16 %v100_v62, %v99_v61  ;;  %v208_v7 = vld [vmem:[#allocation8 + $0x68] sm:$0xff] }
  0x6b   :  { %410 = vmatpush3.bf16.msra.mxu0 %v409_v29  ;;  %v443_v4 = vpack.c.bf16 %v206_v2, %v205_v1  ;;  %v83_v5 = vld [vmem:[#allocation2] sm:$0xff]  ;;  %v446_v8 = vpack.c.bf16 %v208_v7, %v207_v6  ;;  %v210_v10 = vld [vmem:[#allocation8 + $0x78] sm:$0xff]  ;;  %v307_v19 = vld [vmem:[#allocation10] ss:$0 sm:$0xff] }
  0x6c   :  { %412 = vmatprep.subr.bf16.mxu0 %v411_v33  ;;  %v209_v9 = vld [vmem:[#allocation8 + $0x70] sm:$0xff]  ;;  %v306_v14 = vld [vmem:[#allocation7] ss:$0 sm:$0xff] }
  0x6d   :  { %435 = vmatpush3.bf16.msra.mxu1 %v434_v47  ;;  %v449_v11 = vpack.c.bf16 %v210_v10, %v209_v9 }
  0x6e   :  { %436 = vmatprep.subr.bf16.mxu1 %v609_v0 }
  0x6f   :  { %414 = vmatpush3.bf16.msra.mxu0 %v413_v41 }
  0x70   :  { %416 = vmatprep.subr.bf16.mxu0 %v415_v42 }
  0x71   :  { %438 = vmatpush3.bf16.msra.mxu1 %v437_v56 }
  0x72   :  { %439 = vmatprep.subr.bf16.mxu1 %v609_v0 }
  0x73   :  { %418 = vmatpush3.bf16.msra.mxu0 %v417_v50 }
  0x74   :  { %420 = vmatprep.subr.bf16.mxu0 %v419_v51 }
  0x75   :  { %441 = vmatpush3.bf16.msra.mxu1 %v440_v63 }
  0x76   :  { %442 = vmatprep.subr.bf16.mxu1 %v609_v0 }
  0x77   :  { %422 = vmatpush3.bf16.msra.mxu0 %v421_v59 }
  0x78   :  { %424 = vmatprep.subr.bf16.mxu0 %v423_v60 }
  0x79   :  { %444 = vmatpush3.bf16.msra.mxu1 %v443_v4 }
  0x7a   :  { %445 = vmatprep.subr.bf16.mxu1 %v609_v0 }
  0x7b   :  { %426 = vmatpush3.bf16.msra.mxu0 %v425_v3 }
  0x7d   :  { %447 = vmatpush3.bf16.msra.mxu1 %v446_v8 }
  0x7e   :  { %189 = vmatmul.mubr.f32.vlgmr.msra.gmra.mrb[0].mxu0 %v83_v5  ;;  %448 = vmatprep.subr.bf16.mxu1 %v609_v0 }
  0x81   :  { %450 = vmatpush3.bf16.msra.mxu1 %v449_v11 }
 0x151   :  { %v340_v13 = vpop.f32.mrb[0].mxu0 }
 0x152   :  { %v341_v15 = vpop.f32.mrb[1].mxu0 }
 0x153   :  { %v342_v16 = vadd.f32 %v341_v15, %v340_v13 }
 0x155   :  { %v191_v17 = vadd.f32 %v342_v16, %v306_v14 }
 0x157   :  { %v194_v18 = vmax.f32 %v191_v17, 0.0 }
 0x159   :  { %393 = vmatmul.mubr.f32.vlgmr.msra.gmra.mrb[0].mxu1 %v194_v18 }
 0x22c   :  { %v284_v20 = vpop.f32.mrb[0].mxu1 }
 0x22d   :  { %v285_v21 = vadd.f32 %v307_v19, %v284_v20  ;;  %v394_v0 = vpop.f32.mrb[1].mxu1 }
 0x22f   :  { %288 = vst [vmem:[#allocation11] sm:$0xff] %v285_v21 }
 0x230   :  { %583 = shalt.err (!%p580_p2)
}
 0x231   :  { %s584_s30 = scalar_lea.hbm %s728_s5, 128 }
 0x232   :  { %p585_p3 = scmp.ne.s32.totalorder %s728_s5, %s584_s30  ;;  %p588_p4 = scmp.lt.u32.totalorder %s584_s30, %s728_s5 }
 0x234   :  { %p590_p5 = pnand %p588_p4, %p585_p3 }
 0x236   :  { %593 = shalt.err (!%p590_p5)
}
 0x237   :  { %298 = dma.vmem_to_hbm [thread:$0]  %s296_s27, 128, %s728_s5, [#allocation4]  }
 0x238   :  { %600 = dma.done.wait [#allocation4], 128  }
 0x239   :  { %601 = vsyncadd [#allocation4], 4294967168 }
 0x23a   :  { %302 = vsyncpa [#allocation3], 1 }
 0x23b   :  { %303 = vsyncpa [#allocation6], 1 }
 0x23c   :  { %304 = vsyncpa [#allocation9], 1 }
 0x23d   :  { %305 = vsyncpa [#allocation4], 1 }

</bundles_post_ra>
